<compile_context>
chip_gen: v7x
topology: tpu7x:2x2x1
jax: 0.10.0
libtpu: 0.0.40
codegen_flags: <defaults>
</compile_context>

<pallas_src>
from functools import partial

import numpy as np
import jax
import jax.numpy as jnp
from jax.experimental import pallas as pl
from jax.experimental.pallas import tpu as pltpu


# ----------------------------------------------------------------------------
# Glue: relative position index (mirrors gen_relative_position_index in torch)
# ----------------------------------------------------------------------------
def gen_relative_position_index(window_size):
    num_relative_distance = (2 * window_size[0] - 1) * (2 * window_size[1] - 1) + 3
    window_area = window_size[0] * window_size[1]
    coords = np.stack(
        np.meshgrid(np.arange(window_size[0]), np.arange(window_size[1]), indexing="ij")
    )                                                # (2, Wh, Ww)
    coords_flatten = coords.reshape(2, -1)           # (2, Wh*Ww)
    relative_coords = coords_flatten[:, :, None] - coords_flatten[:, None, :]
    relative_coords = relative_coords.transpose(1, 2, 0).copy()
    relative_coords[:, :, 0] += window_size[0] - 1
    relative_coords[:, :, 1] += window_size[1] - 1
    relative_coords[:, :, 0] *= 2 * window_size[1] - 1
    rpi = np.zeros((window_area + 1, window_area + 1), dtype=relative_coords.dtype)
    rpi[1:, 1:] = relative_coords.sum(-1)
    rpi[0, 0:] = num_relative_distance - 3
    rpi[0:, 0] = num_relative_distance - 2
    rpi[0, 0] = num_relative_distance - 1
    return rpi


# ----------------------------------------------------------------------------
# Pallas kernel: one batch block per grid step
# ----------------------------------------------------------------------------
def attention_kernel(x_ref, qkv_w_ref, qkv_b_ref, rel_bias_ref,
                     proj_w_ref, proj_b_ref, o_ref,
                     *, num_heads, head_dim):
    bb, N, C = x_ref.shape
    H, hd = num_heads, head_dim
    AH = H * hd

    x = x_ref[...]                          # (bb, N, C); keep input dtype (bf16-capable)
    cdt = x.dtype

    # ---- fused QKV projection: one lane-dense (C x 3*AH) matmul, f32 accumulate.
    #      (softmax scale is already folded into the q columns + q bias on host)
    qkv = jnp.dot(x.reshape(bb * N, C), qkv_w_ref[...],
                  preferred_element_type=jnp.float32)
    qkv = qkv + qkv_b_ref[...]              # (bb*N, 3*AH) f32
    qkv = qkv.astype(cdt).reshape(bb, N, 3 * AH)

    # ---- per-head attention core (static, unrolled loop; batched over bb).
    #      Only lane slices + leading-batch-dim matmuls: no relayouting
    #      transposes and no per-batch copies of anything.
    head_outs = []
    for h in range(H):
        q_h = qkv[:, :, h * hd:(h + 1) * hd]                       # (bb, N, hd)
        k_h = qkv[:, :, AH + h * hd:AH + (h + 1) * hd]             # (bb, N, hd)
        v_h = qkv[:, :, 2 * AH + h * hd:2 * AH + (h + 1) * hd]     # (bb, N, hd)

        s = jnp.einsum('bnd,bmd->bnm', q_h, k_h,
                       preferred_element_type=jnp.float32)         # (bb, N, N) f32
        s = s + rel_bias_ref[h]             # (N, N) bias; leading-dim broadcast over bb

        # numerically-stable softmax; all elementwise math in f32 (VPU/EUP)
        s = s - jnp.max(s, axis=-1, keepdims=True)
        p = jnp.exp(s)
        denom = jnp.sum(p, axis=-1, keepdims=True)                 # (bb, N, 1)

        # attn_drop is p=0.0 -> identity (inference)
        o_h = jnp.einsum('bnm,bmd->bnd', p.astype(cdt), v_h,
                         preferred_element_type=jnp.float32)       # (bb, N, hd) f32
        # normalize the small (N, hd) output, not the (N, N) probabilities
        o_h = o_h * pl.reciprocal(denom, approx=True)
        head_outs.append(o_h)

    # ---- concat heads -> single lane-dense output projection (AH-deep contraction)
    o = jnp.concatenate(head_outs, axis=-1).astype(cdt)            # (bb, N, AH)
    y = jnp.dot(o.reshape(bb * N, AH), proj_w_ref[...],
                preferred_element_type=jnp.float32)                # (bb*N, C) f32
    y = y + proj_b_ref[...]                                        # (1, C) broadcast
    # proj_drop is p=0.0 -> identity
    o_ref[...] = y.reshape(bb, N, C).astype(o_ref.dtype)


def beit_attention(x, qkv_w, qkv_b, rel_bias, proj_w, proj_b,
                   *, num_heads, head_dim, scale, batch_block=1):
    """x: (B, N, C); qkv_w: (3*AH, C); qkv_b: (3*AH,); rel_bias: (H, N, N);
    proj_w: (C, AH); proj_b: (C,)  -- PyTorch parameter layouts."""
    B, N, C = x.shape
    H, hd = num_heads, head_dim
    AH = H * hd

    # ---- host-side layout plumbing (done once, free):
    #   torch F.linear: x @ W.T + b  ->  pre-transpose W to (C, 3*AH) and
    #   fold the softmax scale into the q columns / q bias.
    col_scale = jnp.concatenate(
        [jnp.full((AH,), scale, dtype=jnp.float32),
         jnp.ones((2 * AH,), dtype=jnp.float32)])
    qkv_w_packed = (qkv_w.astype(jnp.float32).T * col_scale[None, :]).astype(x.dtype)
    qkv_b_packed = (qkv_b.astype(jnp.float32) * col_scale).reshape(1, 3 * AH)
    proj_w_packed = proj_w.T.astype(x.dtype)                       # (AH, C)
    proj_b2 = proj_b.astype(jnp.float32).reshape(1, C)

    # Small batch block (default 1 image) -> multi-step "parallel" grid:
    # restores DMA/compute double-buffering and lets v7x shard steps across
    # its two TensorCores.  Weights stay resident (constant index_map).
    if batch_block is None:
        batch_block = 1
    assert B % batch_block == 0
    grid = (B // batch_block,)

    kernel = partial(attention_kernel, num_heads=H, head_dim=hd)
    return pl.pallas_call(
        kernel,
        out_shape=jax.ShapeDtypeStruct((B, N, C), x.dtype),
        grid=grid,
        in_specs=[
            pl.BlockSpec((batch_block, N, C), lambda b: (b, 0, 0)),  # x (streamed)
            pl.BlockSpec((C, 3 * AH), lambda b: (0, 0)),             # fused qkv weight (resident)
            pl.BlockSpec((1, 3 * AH), lambda b: (0, 0)),             # fused qkv bias (resident)
            pl.BlockSpec((H, N, N), lambda b: (0, 0, 0)),            # rel-pos bias (resident)
            pl.BlockSpec((AH, C), lambda b: (0, 0)),                 # proj weight (resident)
            pl.BlockSpec((1, C), lambda b: (0, 0)),                  # proj bias (resident)
        ],
        out_specs=pl.BlockSpec((batch_block, N, C), lambda b: (b, 0, 0)),
        compiler_params=pltpu.CompilerParams(
            dimension_semantics=("parallel",),
            # sized against v7x's 64 MiB physical VMEM per TensorCore
            vmem_limit_bytes=48 * 1024 * 1024),
    )(x, qkv_w_packed, qkv_b_packed, rel_bias, proj_w_packed, proj_b2)


# ----------------------------------------------------------------------------
# Pure-JAX reference (correctness check)
# ----------------------------------------------------------------------------
def reference_attention(x, qkv_w, qkv_b, rel_bias, proj_w, proj_b,
                        *, num_heads, head_dim, scale):
    B, N, C = x.shape
    qkv = jnp.einsum("bnc,oc->bno", x, qkv_w) + qkv_b
    qkv = qkv.reshape(B, N, 3, num_heads, head_dim).transpose(2, 0, 3, 1, 4)
    q, k, v = qkv[0], qkv[1], qkv[2]
    q = q * scale
    attn = jnp.einsum("bhnd,bhmd->bhnm", q, k) + rel_bias[None]
    attn = jax.nn.softmax(attn, axis=-1)
    out = jnp.einsum("bhnm,bhmd->bhnd", attn, v)
    out = out.transpose(0, 2, 1, 3).reshape(B, N, num_heads * head_dim)
    return jnp.einsum("bnd,cd->bnc", out, proj_w) + proj_b


# ----------------------------------------------------------------------------
if __name__ == "__main__":
    # Small shapes consistent with the module.
    dim = 32
    num_heads = 4
    head_dim = dim // num_heads
    all_head_dim = head_dim * num_heads
    scale = head_dim ** (-0.5)
    window_size = (4, 4)
    N = window_size[0] * window_size[1] + 1          # 17 tokens (cls + 4x4 window)
    B = 2
    num_relative_distance = (2 * window_size[0] - 1) * (2 * window_size[1] - 1) + 3

    key = jax.random.PRNGKey(0)
    k_x, k_w, k_qb, k_vb, k_tab, k_pw, k_pb = jax.random.split(key, 7)

    # Deterministic synthetic parameters (qkv_bias=True configuration).
    x = jax.random.normal(k_x, (B, N, dim), dtype=jnp.float32)
    qkv_w = jax.random.normal(k_w, (3 * all_head_dim, dim), dtype=jnp.float32) * 0.05
    q_bias = jax.random.normal(k_qb, (all_head_dim,), dtype=jnp.float32) * 0.05
    k_bias = jnp.zeros((all_head_dim,), dtype=jnp.float32)                 # buffer, always 0
    v_bias = jax.random.normal(k_vb, (all_head_dim,), dtype=jnp.float32) * 0.05
    qkv_bias = jnp.concatenate([q_bias, k_bias, v_bias])                   # (3*all_head_dim,)
    rel_pos_table = jax.random.normal(
        k_tab, (num_relative_distance, num_heads), dtype=jnp.float32) * 0.05
    proj_w = jax.random.normal(k_pw, (dim, all_head_dim), dtype=jnp.float32) * 0.05
    proj_b = jax.random.normal(k_pb, (dim,), dtype=jnp.float32) * 0.05

    # _get_rel_pos_bias: gather + permute done in plain JAX (glue), shape (H, N, N)
    rpi = jnp.asarray(gen_relative_position_index(window_size))
    rel_bias = rel_pos_table[rpi.reshape(-1)].reshape(N, N, num_heads)
    rel_bias = jnp.transpose(rel_bias, (2, 0, 1))                          # (H, N, N)

    out = beit_attention(x, qkv_w, qkv_bias, rel_bias, proj_w, proj_b,
                         num_heads=num_heads, head_dim=head_dim, scale=scale)
    out = jax.block_until_ready(out)

    ref = reference_attention(x, qkv_w, qkv_bias, rel_bias, proj_w, proj_b,
                              num_heads=num_heads, head_dim=head_dim, scale=scale)
    ref = jax.block_until_ready(ref)

    assert out.shape == (B, N, dim)
    # Tolerance slightly loosened vs. exact f32 because the kernel uses the
    # EUP approximate reciprocal for the softmax normalization.
    np.testing.assert_allclose(np.asarray(out), np.asarray(ref), rtol=5e-3, atol=5e-3)
    print("KERNEL_OK")
</pallas_src>

<mosaic_0001>
module attributes {stable_mosaic.version = 11 : i64} {
  func.func @attention_kernel(%arg0: i32, %arg1: memref<1x17x32xf32, #tpu.memory_space<vmem>>, %arg2: memref<32x96xf32, #tpu.memory_space<vmem>>, %arg3: memref<1x96xf32, #tpu.memory_space<vmem>>, %arg4: memref<4x17x17xf32, #tpu.memory_space<vmem>>, %arg5: memref<32x32xf32, #tpu.memory_space<vmem>>, %arg6: memref<1x32xf32, #tpu.memory_space<vmem>>, %arg7: memref<1x17x32xf32, #tpu.memory_space<vmem>>) attributes {dimension_semantics = [#tpu.dimension_semantics<parallel>], iteration_bounds = array<i64: 2>, scalar_prefetch = 0 : i64, scratch_operands = 0 : i64, tpu.core_type = #tpu.core_type<tc>, window_params = [{transform_indices = @transform_0, window_bounds = array<i64: 1, 17, 32>}, {pipeline_mode = #tpu.pipeline_mode<synchronous>, transform_indices = @transform_1, window_bounds = array<i64: 32, 96>}, {pipeline_mode = #tpu.pipeline_mode<synchronous>, transform_indices = @transform_2, window_bounds = array<i64: 1, 96>}, {pipeline_mode = #tpu.pipeline_mode<synchronous>, transform_indices = @transform_3, window_bounds = array<i64: 4, 17, 17>}, {pipeline_mode = #tpu.pipeline_mode<synchronous>, transform_indices = @transform_4, window_bounds = array<i64: 32, 32>}, {pipeline_mode = #tpu.pipeline_mode<synchronous>, transform_indices = @transform_5, window_bounds = array<i64: 1, 32>}, {transform_indices = @transform_6, window_bounds = array<i64: 1, 17, 32>}]} {
    %c0 = arith.constant 0 : index
    %c0_0 = arith.constant 0 : index
    %c0_1 = arith.constant 0 : index
    %0 = vector.load %arg1[%c0, %c0_0, %c0_1] : memref<1x17x32xf32, #tpu.memory_space<vmem>>, vector<1x17x32xf32>
    %1 = vector.shape_cast %0 : vector<1x17x32xf32> to vector<17x32xf32>
    %c0_2 = arith.constant 0 : index
    %c0_3 = arith.constant 0 : index
    %2 = vector.load %arg2[%c0_2, %c0_3] : memref<32x96xf32, #tpu.memory_space<vmem>>, vector<32x96xf32>
    %cst = arith.constant dense<0.000000e+00> : vector<17x96xf32>
    %3 = tpu.matmul %1, %2, %cst {dimension_numbers = #tpu.dot_dimension_numbers<[1], [0], [0], [1], [0, 0, 1, 1], [], []>} : vector<17x32xf32>, vector<32x96xf32>, vector<17x96xf32> -> vector<17x96xf32>
    %c0_4 = arith.constant 0 : index
    %c0_5 = arith.constant 0 : index
    %4 = vector.load %arg3[%c0_4, %c0_5] : memref<1x96xf32, #tpu.memory_space<vmem>>, vector<1x96xf32>
    %5 = vector.broadcast %4 : vector<1x96xf32> to vector<17x96xf32>
    %6 = arith.addf %3, %5 : vector<17x96xf32>
    %7 = vector.shape_cast %6 : vector<17x96xf32> to vector<1x17x96xf32>
    %8 = vector.extract_strided_slice %7 {offsets = [0, 0, 0], sizes = [1, 17, 8], strides = [1, 1, 1]} : vector<1x17x96xf32> to vector<1x17x8xf32>
    %9 = vector.extract_strided_slice %7 {offsets = [0, 0, 32], sizes = [1, 17, 8], strides = [1, 1, 1]} : vector<1x17x96xf32> to vector<1x17x8xf32>
    %10 = vector.extract_strided_slice %7 {offsets = [0, 0, 64], sizes = [1, 17, 8], strides = [1, 1, 1]} : vector<1x17x96xf32> to vector<1x17x8xf32>
    "tpu.trace_start"() <{level = 10 : i32, message = "bnd,bmd->bnm"}> : () -> ()
    %cst_6 = arith.constant dense<0.000000e+00> : vector<1x17x17xf32>
    %11 = tpu.matmul %8, %9, %cst_6 {dimension_numbers = #tpu.dot_dimension_numbers<[2], [2], [1], [1], [0, 0, 0, 1, 1, 1], [0], [0]>} : vector<1x17x8xf32>, vector<1x17x8xf32>, vector<1x17x17xf32> -> vector<1x17x17xf32>
    "tpu.trace_stop"() : () -> ()
    %c0_7 = arith.constant 0 : index
    %c0_8 = arith.constant 0 : index
    %c0_9 = arith.constant 0 : index
    %12 = vector.load %arg4[%c0_7, %c0_8, %c0_9] : memref<4x17x17xf32, #tpu.memory_space<vmem>>, vector<1x17x17xf32>
    %13 = vector.shape_cast %12 : vector<1x17x17xf32> to vector<17x17xf32>
    %14 = vector.shape_cast %13 : vector<17x17xf32> to vector<1x17x17xf32>
    %15 = arith.addf %11, %14 : vector<1x17x17xf32>
    %cst_10 = arith.constant dense<0xFF800000> : vector<1x17xf32>
    %16 = vector.multi_reduction <maximumf>, %15, %cst_10 [2] : vector<1x17x17xf32> to vector<1x17xf32>
    %17 = vector.shape_cast %16 : vector<1x17xf32> to vector<1x17x1xf32>
    %18 = vector.broadcast %17 : vector<1x17x1xf32> to vector<1x17x17xf32>
    %19 = arith.subf %15, %18 : vector<1x17x17xf32>
    %20 = math.exp %19 : vector<1x17x17xf32>
    %cst_11 = arith.constant dense<0.000000e+00> : vector<1x17xf32>
    %21 = vector.multi_reduction <add>, %20, %cst_11 [2] : vector<1x17x17xf32> to vector<1x17xf32>
    %22 = vector.shape_cast %21 : vector<1x17xf32> to vector<1x17x1xf32>
    "tpu.trace_start"() <{level = 10 : i32, message = "bnm,bmd->bnd"}> : () -> ()
    %cst_12 = arith.constant dense<0.000000e+00> : vector<1x17x8xf32>
    %23 = tpu.matmul %20, %10, %cst_12 {dimension_numbers = #tpu.dot_dimension_numbers<[2], [1], [1], [2], [0, 0, 0, 1, 1, 2], [0], [0]>} : vector<1x17x17xf32>, vector<1x17x8xf32>, vector<1x17x8xf32> -> vector<1x17x8xf32>
    "tpu.trace_stop"() : () -> ()
    %24 = tpu.reciprocal %22 {approx = true} : vector<1x17x1xf32> -> vector<1x17x1xf32>
    %25 = vector.broadcast %24 : vector<1x17x1xf32> to vector<1x17x8xf32>
    %26 = arith.mulf %23, %25 : vector<1x17x8xf32>
    %27 = vector.extract_strided_slice %7 {offsets = [0, 0, 8], sizes = [1, 17, 8], strides = [1, 1, 1]} : vector<1x17x96xf32> to vector<1x17x8xf32>
    %28 = vector.extract_strided_slice %7 {offsets = [0, 0, 40], sizes = [1, 17, 8], strides = [1, 1, 1]} : vector<1x17x96xf32> to vector<1x17x8xf32>
    %29 = vector.extract_strided_slice %7 {offsets = [0, 0, 72], sizes = [1, 17, 8], strides = [1, 1, 1]} : vector<1x17x96xf32> to vector<1x17x8xf32>
    "tpu.trace_start"() <{level = 10 : i32, message = "bnd,bmd->bnm"}> : () -> ()
    %cst_13 = arith.constant dense<0.000000e+00> : vector<1x17x17xf32>
    %30 = tpu.matmul %27, %28, %cst_13 {dimension_numbers = #tpu.dot_dimension_numbers<[2], [2], [1], [1], [0, 0, 0, 1, 1, 1], [0], [0]>} : vector<1x17x8xf32>, vector<1x17x8xf32>, vector<1x17x17xf32> -> vector<1x17x17xf32>
    "tpu.trace_stop"() : () -> ()
    %c1 = arith.constant 1 : index
    %c0_14 = arith.constant 0 : index
    %c0_15 = arith.constant 0 : index
    %31 = vector.load %arg4[%c1, %c0_14, %c0_15] : memref<4x17x17xf32, #tpu.memory_space<vmem>>, vector<1x17x17xf32>
    %32 = vector.shape_cast %31 : vector<1x17x17xf32> to vector<17x17xf32>
    %33 = vector.shape_cast %32 : vector<17x17xf32> to vector<1x17x17xf32>
    %34 = arith.addf %30, %33 : vector<1x17x17xf32>
    %cst_16 = arith.constant dense<0xFF800000> : vector<1x17xf32>
    %35 = vector.multi_reduction <maximumf>, %34, %cst_16 [2] : vector<1x17x17xf32> to vector<1x17xf32>
    %36 = vector.shape_cast %35 : vector<1x17xf32> to vector<1x17x1xf32>
    %37 = vector.broadcast %36 : vector<1x17x1xf32> to vector<1x17x17xf32>
    %38 = arith.subf %34, %37 : vector<1x17x17xf32>
    %39 = math.exp %38 : vector<1x17x17xf32>
    %cst_17 = arith.constant dense<0.000000e+00> : vector<1x17xf32>
    %40 = vector.multi_reduction <add>, %39, %cst_17 [2] : vector<1x17x17xf32> to vector<1x17xf32>
    %41 = vector.shape_cast %40 : vector<1x17xf32> to vector<1x17x1xf32>
    "tpu.trace_start"() <{level = 10 : i32, message = "bnm,bmd->bnd"}> : () -> ()
    %cst_18 = arith.constant dense<0.000000e+00> : vector<1x17x8xf32>
    %42 = tpu.matmul %39, %29, %cst_18 {dimension_numbers = #tpu.dot_dimension_numbers<[2], [1], [1], [2], [0, 0, 0, 1, 1, 2], [0], [0]>} : vector<1x17x17xf32>, vector<1x17x8xf32>, vector<1x17x8xf32> -> vector<1x17x8xf32>
    "tpu.trace_stop"() : () -> ()
    %43 = tpu.reciprocal %41 {approx = true} : vector<1x17x1xf32> -> vector<1x17x1xf32>
    %44 = vector.broadcast %43 : vector<1x17x1xf32> to vector<1x17x8xf32>
    %45 = arith.mulf %42, %44 : vector<1x17x8xf32>
    %46 = vector.extract_strided_slice %7 {offsets = [0, 0, 16], sizes = [1, 17, 8], strides = [1, 1, 1]} : vector<1x17x96xf32> to vector<1x17x8xf32>
    %47 = vector.extract_strided_slice %7 {offsets = [0, 0, 48], sizes = [1, 17, 8], strides = [1, 1, 1]} : vector<1x17x96xf32> to vector<1x17x8xf32>
    %48 = vector.extract_strided_slice %7 {offsets = [0, 0, 80], sizes = [1, 17, 8], strides = [1, 1, 1]} : vector<1x17x96xf32> to vector<1x17x8xf32>
    "tpu.trace_start"() <{level = 10 : i32, message = "bnd,bmd->bnm"}> : () -> ()
    %cst_19 = arith.constant dense<0.000000e+00> : vector<1x17x17xf32>
    %49 = tpu.matmul %46, %47, %cst_19 {dimension_numbers = #tpu.dot_dimension_numbers<[2], [2], [1], [1], [0, 0, 0, 1, 1, 1], [0], [0]>} : vector<1x17x8xf32>, vector<1x17x8xf32>, vector<1x17x17xf32> -> vector<1x17x17xf32>
    "tpu.trace_stop"() : () -> ()
    %c2 = arith.constant 2 : index
    %c0_20 = arith.constant 0 : index
    %c0_21 = arith.constant 0 : index
    %50 = vector.load %arg4[%c2, %c0_20, %c0_21] : memref<4x17x17xf32, #tpu.memory_space<vmem>>, vector<1x17x17xf32>
    %51 = vector.shape_cast %50 : vector<1x17x17xf32> to vector<17x17xf32>
    %52 = vector.shape_cast %51 : vector<17x17xf32> to vector<1x17x17xf32>
    %53 = arith.addf %49, %52 : vector<1x17x17xf32>
    %cst_22 = arith.constant dense<0xFF800000> : vector<1x17xf32>
    %54 = vector.multi_reduction <maximumf>, %53, %cst_22 [2] : vector<1x17x17xf32> to vector<1x17xf32>
    %55 = vector.shape_cast %54 : vector<1x17xf32> to vector<1x17x1xf32>
    %56 = vector.broadcast %55 : vector<1x17x1xf32> to vector<1x17x17xf32>
    %57 = arith.subf %53, %56 : vector<1x17x17xf32>
    %58 = math.exp %57 : vector<1x17x17xf32>
    %cst_23 = arith.constant dense<0.000000e+00> : vector<1x17xf32>
    %59 = vector.multi_reduction <add>, %58, %cst_23 [2] : vector<1x17x17xf32> to vector<1x17xf32>
    %60 = vector.shape_cast %59 : vector<1x17xf32> to vector<1x17x1xf32>
    "tpu.trace_start"() <{level = 10 : i32, message = "bnm,bmd->bnd"}> : () -> ()
    %cst_24 = arith.constant dense<0.000000e+00> : vector<1x17x8xf32>
    %61 = tpu.matmul %58, %48, %cst_24 {dimension_numbers = #tpu.dot_dimension_numbers<[2], [1], [1], [2], [0, 0, 0, 1, 1, 2], [0], [0]>} : vector<1x17x17xf32>, vector<1x17x8xf32>, vector<1x17x8xf32> -> vector<1x17x8xf32>
    "tpu.trace_stop"() : () -> ()
    %62 = tpu.reciprocal %60 {approx = true} : vector<1x17x1xf32> -> vector<1x17x1xf32>
    %63 = vector.broadcast %62 : vector<1x17x1xf32> to vector<1x17x8xf32>
    %64 = arith.mulf %61, %63 : vector<1x17x8xf32>
    %65 = vector.extract_strided_slice %7 {offsets = [0, 0, 24], sizes = [1, 17, 8], strides = [1, 1, 1]} : vector<1x17x96xf32> to vector<1x17x8xf32>
    %66 = vector.extract_strided_slice %7 {offsets = [0, 0, 56], sizes = [1, 17, 8], strides = [1, 1, 1]} : vector<1x17x96xf32> to vector<1x17x8xf32>
    %67 = vector.extract_strided_slice %7 {offsets = [0, 0, 88], sizes = [1, 17, 8], strides = [1, 1, 1]} : vector<1x17x96xf32> to vector<1x17x8xf32>
    "tpu.trace_start"() <{level = 10 : i32, message = "bnd,bmd->bnm"}> : () -> ()
    %cst_25 = arith.constant dense<0.000000e+00> : vector<1x17x17xf32>
    %68 = tpu.matmul %65, %66, %cst_25 {dimension_numbers = #tpu.dot_dimension_numbers<[2], [2], [1], [1], [0, 0, 0, 1, 1, 1], [0], [0]>} : vector<1x17x8xf32>, vector<1x17x8xf32>, vector<1x17x17xf32> -> vector<1x17x17xf32>
    "tpu.trace_stop"() : () -> ()
    %c3 = arith.constant 3 : index
    %c0_26 = arith.constant 0 : index
    %c0_27 = arith.constant 0 : index
    %69 = vector.load %arg4[%c3, %c0_26, %c0_27] : memref<4x17x17xf32, #tpu.memory_space<vmem>>, vector<1x17x17xf32>
    %70 = vector.shape_cast %69 : vector<1x17x17xf32> to vector<17x17xf32>
    %71 = vector.shape_cast %70 : vector<17x17xf32> to vector<1x17x17xf32>
    %72 = arith.addf %68, %71 : vector<1x17x17xf32>
    %cst_28 = arith.constant dense<0xFF800000> : vector<1x17xf32>
    %73 = vector.multi_reduction <maximumf>, %72, %cst_28 [2] : vector<1x17x17xf32> to vector<1x17xf32>
    %74 = vector.shape_cast %73 : vector<1x17xf32> to vector<1x17x1xf32>
    %75 = vector.broadcast %74 : vector<1x17x1xf32> to vector<1x17x17xf32>
    %76 = arith.subf %72, %75 : vector<1x17x17xf32>
    %77 = math.exp %76 : vector<1x17x17xf32>
    %cst_29 = arith.constant dense<0.000000e+00> : vector<1x17xf32>
    %78 = vector.multi_reduction <add>, %77, %cst_29 [2] : vector<1x17x17xf32> to vector<1x17xf32>
    %79 = vector.shape_cast %78 : vector<1x17xf32> to vector<1x17x1xf32>
    "tpu.trace_start"() <{level = 10 : i32, message = "bnm,bmd->bnd"}> : () -> ()
    %cst_30 = arith.constant dense<0.000000e+00> : vector<1x17x8xf32>
    %80 = tpu.matmul %77, %67, %cst_30 {dimension_numbers = #tpu.dot_dimension_numbers<[2], [1], [1], [2], [0, 0, 0, 1, 1, 2], [0], [0]>} : vector<1x17x17xf32>, vector<1x17x8xf32>, vector<1x17x8xf32> -> vector<1x17x8xf32>
    "tpu.trace_stop"() : () -> ()
    %81 = tpu.reciprocal %79 {approx = true} : vector<1x17x1xf32> -> vector<1x17x1xf32>
    %82 = vector.broadcast %81 : vector<1x17x1xf32> to vector<1x17x8xf32>
    %83 = arith.mulf %80, %82 : vector<1x17x8xf32>
    %84 = tpu.concatenate %26, %45, %64, %83 in 2 : vector<1x17x8xf32>, vector<1x17x8xf32>, vector<1x17x8xf32>, vector<1x17x8xf32> -> vector<1x17x32xf32>
    %85 = vector.shape_cast %84 : vector<1x17x32xf32> to vector<17x32xf32>
    %c0_31 = arith.constant 0 : index
    %c0_32 = arith.constant 0 : index
    %86 = vector.load %arg5[%c0_31, %c0_32] : memref<32x32xf32, #tpu.memory_space<vmem>>, vector<32x32xf32>
    %cst_33 = arith.constant dense<0.000000e+00> : vector<17x32xf32>
    %87 = tpu.matmul %85, %86, %cst_33 {dimension_numbers = #tpu.dot_dimension_numbers<[1], [0], [0], [1], [0, 0, 1, 1], [], []>} : vector<17x32xf32>, vector<32x32xf32>, vector<17x32xf32> -> vector<17x32xf32>
    %c0_34 = arith.constant 0 : index
    %c0_35 = arith.constant 0 : index
    %88 = vector.load %arg6[%c0_34, %c0_35] : memref<1x32xf32, #tpu.memory_space<vmem>>, vector<1x32xf32>
    %89 = vector.broadcast %88 : vector<1x32xf32> to vector<17x32xf32>
    %90 = arith.addf %87, %89 : vector<17x32xf32>
    %91 = vector.shape_cast %90 : vector<17x32xf32> to vector<1x17x32xf32>
    %c0_36 = arith.constant 0 : index
    %c0_37 = arith.constant 0 : index
    %c0_38 = arith.constant 0 : index
    %92 = vector.load %arg7[%c0_36, %c0_37, %c0_38] : memref<1x17x32xf32, #tpu.memory_space<vmem>>, vector<1x17x32xf32>
    tpu.vector_store %arg7[%c0_36, %c0_37, %c0_38], %91 {strides = array<i32>} : memref<1x17x32xf32, #tpu.memory_space<vmem>>, vector<1x17x32xf32>,
    return
  }
  func.func @transform_0(%arg0: i32) -> (i32, i32, i32) {
    %c0_i32 = arith.constant 0 : i32
    %c0_i32_0 = arith.constant 0 : i32
    %c0_i32_1 = arith.constant 0 : i32
    return %arg0, %c0_i32, %c0_i32_0 : i32, i32, i32
  }
  func.func @transform_1(%arg0: i32) -> (i32, i32) {
    %c0_i32 = arith.constant 0 : i32
    %c0_i32_0 = arith.constant 0 : i32
    %c0_i32_1 = arith.constant 0 : i32
    return %c0_i32, %c0_i32_0 : i32, i32
  }
  func.func @transform_2(%arg0: i32) -> (i32, i32) {
    %c0_i32 = arith.constant 0 : i32
    %c0_i32_0 = arith.constant 0 : i32
    %c0_i32_1 = arith.constant 0 : i32
    return %c0_i32, %c0_i32_0 : i32, i32
  }
  func.func @transform_3(%arg0: i32) -> (i32, i32, i32) {
    %c0_i32 = arith.constant 0 : i32
    %c0_i32_0 = arith.constant 0 : i32
    %c0_i32_1 = arith.constant 0 : i32
    %c0_i32_2 = arith.constant 0 : i32
    return %c0_i32, %c0_i32_0, %c0_i32_1 : i32, i32, i32
  }
  func.func @transform_4(%arg0: i32) -> (i32, i32) {
    %c0_i32 = arith.constant 0 : i32
    %c0_i32_0 = arith.constant 0 : i32
    %c0_i32_1 = arith.constant 0 : i32
    return %c0_i32, %c0_i32_0 : i32, i32
  }
  func.func @transform_5(%arg0: i32) -> (i32, i32) {
    %c0_i32 = arith.constant 0 : i32
    %c0_i32_0 = arith.constant 0 : i32
    %c0_i32_1 = arith.constant 0 : i32
    return %c0_i32, %c0_i32_0 : i32, i32
  }
  func.func @transform_6(%arg0: i32) -> (i32, i32, i32) {
    %c0_i32 = arith.constant 0 : i32
    %c0_i32_0 = arith.constant 0 : i32
    %c0_i32_1 = arith.constant 0 : i32
    return %arg0, %c0_i32, %c0_i32_0 : i32, i32, i32
  }
}

</mosaic_0001>

<bundles_post_ra>
// kernel: tpu_custom_call.1
= control target key start
LH: loop header
LB: loop body
LE: loop exit
PB: predicated region body
PF: predicated region fallthrough
CT: control target
= control target key end

     0   :  { %s2018_s21 = smov 0   ;;  %s2374_s0 = inlined_call_operand.vmem [shape: f32[2,17,32], index: 0, kind: input, shape index: {}]   ;;  %s2375_s1 = inlined_call_operand.vmem [shape: f32[32,96], index: 1, kind: input, shape index: {}]   ;;  %s2376_s2 = inlined_call_operand.vmem [shape: f32[1,96], index: 2, kind: input, shape index: {}]   ;;  %s2377_s3 = inlined_call_operand.vmem [shape: f32[4,17,17], index: 3, kind: input, shape index: {}]   ;;  %s2378_s4 = inlined_call_operand.vmem [shape: f32[32,32], index: 4, kind: input, shape index: {}]   ;;  %s2379_s5 = inlined_call_operand.vmem [shape: f32[1,32], index: 5, kind: input, shape index: {}]   ;;  %s2380_s6 = inlined_call_operand.vmem [shape: f32[2,17,32], index: 6, kind: output, shape index: {}]  }
   0x1 LB: > { %s1522_s22 = sadd.s32 4294967295, %s1964_s21   ;;  %p1526_p0 = scmp.ge.s32.totalorder %s1964_s21, 1  ;;  %s1964_s21 = sphi %s2018_s21, %s16_s21  }
   0x2   : > { %p212_p1 = scmp.lt.s32.totalorder %s1964_s21, 3 }
   0x4   : > { %p213_p2 = pnand %p1526_p0, %p212_p1 }
   0x5   : > { %v255_v0 = vld [vmem:[%s2375_s1] sm:$0xff] (!%p213_p2)  ;;  %v256_v1 = vld [vmem:[%s2375_s1 + $0x8] sm:$0xff] (!%p213_p2)  ;;  %v257_v2 = vld [vmem:[%s2375_s1 + $0x10] sm:$0xff] (!%p213_p2)  ;;  %v1966_v3 = vmov (!%p213_p2), 0.0|0.0   ;;  %vm1967_vm0 = vmmov (!%p213_p2), 0   ;;  %v1968_v6 = vmov (!%p213_p2), 0.0  }
   0x6   : > { %216 = sbr.rel (%p213_p2) target bundleno = 1371 (0x55b), region = 44  ;;  %1804 = vmatprep.subr.bf16.mxu0 (!%p213_p2), %v1966_v3  ;;  %v1805_v4 = vpack.c.bf16 (!%p213_p2), %v256_v1, %v255_v0  ;;  %v258_v5 = vld [vmem:[%s2375_s1 + $0x18] sm:$0xff] (!%p213_p2)  ;;  %1658 = vmatprep.mubr.msk.f32.mxu0 (!%p213_p2), %vm1967_vm0, %v1968_v6  ;;  %p242_p3 = scmp.lt.s32.totalorder (!%p213_p2), %s1522_s22, 1  ;;  %vm266_vm1 = vcmask (!%p213_p2), 261120   ;;  %v1529_v13 = vld [vmem:[%s2376_s2] ss:$0 sm:$0xff] (!%p213_p2) }
   0x7   : > { %1810 = vmatprep.subr.bf16.mxu1 (!%p213_p2), %v1966_v3  ;;  %1673 = vmatprep.mubr.msk.f32.mxu1 (!%p213_p2), %vm1967_vm0, %v1968_v6  ;;  %v1808_v7 = vpack.c.bf16 (!%p213_p2), %v258_v5, %v257_v2  ;;  %s1969_s13 = smov (!%p213_p2), 88   ;;  %s1970_s14 = smov (!%p213_p2), 96   ;;  %vm368_vm2 = vcmask (!%p213_p2), 64512   ;;  %vm507_vm4 = vcmask (!%p213_p2), 1040384   ;;  %v356_v57 = vld [vmem:[%s2377_s3] sm:$0xff] (!%p213_p2)  ;;  %vm461_vm5 = vcmask (!%p213_p2), 138240  }
   0x8   : > { %1806 = vmatpush3.bf16.msra.mxu0 (!%p213_p2), %v1805_v4  ;;  %s1971_s15 = smov (!%p213_p2), 120   ;;  %s1972_s16 = smov (!%p213_p2), 80   ;;  %vm2087_vm3 = vmpackc.low (!%p213_p2), %vm368_vm2, %vm368_vm2  ;;  %v357_v61 = vld [vmem:[%s2377_s3 + $0x8] sm:$0xff] (!%p213_p2)  ;;  %v358_v2 = vld [vmem:[%s2377_s3 + $0x10] sm:$0x1] (!%p213_p2)  ;;  %vm468_vm6 = vcmask (!%p213_p2), 131072  }
   0x9   : > { %1807 = vmatprep.subr.bf16.mxu0 (!%p213_p2), %v1966_v3  ;;  %s1973_s17 = smov (!%p213_p2), 72   ;;  %s1974_s18 = smov (!%p213_p2), 112   ;;  %v1556_v26 = vld [vmem:[%s2377_s3 + $0x30] sm:$0xff] (!%p213_p2)  ;;  %vm1355_vm7 = vcmask (!%p213_p2), 130048   ;;  %vm1359_vm8 = vcmask (!%p213_p2), 195584   ;;  %vm1465_vm9 = vcmask (!%p213_p2), 253952  }
   0xa   : > { %s1975_s19 = smov (!%p213_p2), 104   ;;  %s1976_s20 = smov (!%p213_p2), 64  }
   0xb   : > { %s1977_s23 = smov (!%p213_p2), 56   ;;  %s1979_s28 = smov (!%p213_p2), 40  }
   0xc   : > { %1809 = vmatpush3.bf16.msra.mxu0 (!%p213_p2), %v1808_v7  ;;  %s1980_s29 = smov (!%p213_p2), 8   ;;  %s1981_s30 = smov (!%p213_p2), 16  }
   0xd   : > { %s2384_s22 = smov (!%p242_p3, %s1522_s22), 1  ;;  %1814 = vmatprep.subr.bf16.mxu0 %v1966_v3 }
   0xe   : > { %s1844_s7 = smul.u32 24, %s2384_s22 }
  0x10   : > { %s246_s10 = scalar_lea.vmem %s2374_s0, %s1844_s7 }
  0x11   : > { %v252_v8 = vld [vmem:[%s246_s10] sm:$0xff]  ;;  %v253_v9 = vld [vmem:[%s246_s10 + $0x8] sm:$0xff]  ;;  %v254_v10 = vld [vmem:[%s246_s10 + $0x10] sm:$0x1] }
  0x12   : > { %1659 = vmatmul.mubr.msk.f32.vlgmr.msra.gmra.mrb[0].mxu0 %vm266_vm1, %v252_v8 }
  0x13   : > { %1661 = vmatprep.mubr.msk.f32.mxu0 %vm1967_vm0, %v1968_v6 }
  0x16   : > { %1662 = vmatmul.mubr.msk.f32.gmra.mrb[2].mxu0 %vm266_vm1, %v253_v9  ;;  %v1543_v9 = vld [vmem:[%s2377_s3 + $0x18] sm:$0xff] }
  0x17   : > { %1664 = vmatprep.mubr.msk.f32.mxu0 %vm1967_vm0, %v1968_v6 }
  0x1a   : > { %1665 = vmatmul.mubr.msk.f32.gmra.mrb[4].mxu0 %vm266_vm1, %v254_v10 }
  0x1b   : > { %1688 = vmatprep.mubr.msk.f32.mxu0 %vm1967_vm0, %v1968_v6 }
  0xe5   : > { %v342_v11 = vpop.f32.mrb[0].mxu0 }
  0xe6   : > { %v1660_v12 = vpop.f32.mrb[1].mxu0  ;;  %v343_v15 = vadd.f32 %v1529_v13, %v342_v11 }
  0xe9   : > { %v347_v14 = vpop.f32.mrb[2].mxu0 }
  0xea   : > { %v348_v16 = vadd.f32 %v1529_v13, %v347_v14  ;;  %v1663_v17 = vpop.f32.mrb[3].mxu0  ;;  %v1544_v14 = vld [vmem:[%s2377_s3 + $0x20] sm:$0xff] }
  0xec   : > { %v2066_v18 = vpack.i.bf16 %v348_v16, %v343_v15 }
  0xed   : > { %v352_v19 = vpop.f32.mrb[4].mxu0 }
  0xee   : > { %1876 = vrot.lane.b32.xlu1 %v2066_v18, %s1969_s13  ;;  %1871 = vrot.lane.b32.xlu0 %v2066_v18, %s1970_s14  ;;  %v2070_v20 = vadd.f32 %v1529_v13, %v352_v19  ;;  %v1666_v21 = vpop.f32.mrb[5].mxu0 }
  0xef   : > { %v1545_v21 = vld [vmem:[%s2377_s3 + $0x28] sm:$0x1] }
  0xf2   : > { %610 = vrot.lane.b32.xlu1 %v2070_v20, %s1969_s13  ;;  %366 = vrot.lane.b32.xlu0 %v2070_v20, %s1970_s14 }
  0xf6   : > { %600 = vrot.lane.b32.xlu1 %v343_v15, %s1971_s15  ;;  %1881 = vrot.lane.b32.xlu0 %v2066_v18, %s1972_s16 }
  0xfa   : > { %604 = vrot.lane.b32.xlu1 %v2070_v20, %s1971_s15  ;;  %602 = vrot.lane.b32.xlu0 %v348_v16, %s1971_s15 }
  0xfe   : > { %1886 = vrot.lane.b32.xlu1 %v2066_v18, %s1973_s17  ;;  %850 = vrot.lane.b32.xlu0 %v2070_v20, %s1972_s16  ;;  %s1982_s16 = smov 24  }
 0x102   : > { %842 = vrot.lane.b32.xlu1 %v348_v16, %s1974_s18  ;;  %840 = vrot.lane.b32.xlu0 %v343_v15, %s1974_s18 }
 0x106   : > { %1090 = vrot.lane.b32.xlu1 %v2070_v20, %s1973_s17  ;;  %844 = vrot.lane.b32.xlu0 %v2070_v20, %s1974_s18 }
 0x10a   : > { %1082 = vrot.lane.b32.xlu1 %v348_v16, %s1975_s19  ;;  %1080 = vrot.lane.b32.xlu0 %v343_v15, %s1975_s19 }
 0x10e   : > { %494 = vrot.lane.b32.xlu1 %v2070_v20, %s1976_s20  ;;  %1084 = vrot.lane.b32.xlu0 %v2070_v20, %s1975_s19  ;;  %s1978_s19 = smov 48  }
 0x112   : > { %735 = vrot.lane.b32.xlu1 %v2070_v20, %s1977_s23  ;;  %1891 = vrot.lane.b32.xlu0 %v2066_v18, %s1976_s20 }
 0x116   : > { %1896 = vrot.lane.b32.xlu0 %v2066_v18, %s1977_s23  ;;  %s251_s23 = scalar_lea.vmem %s2380_s6, %s1844_s7 }
 0x160   : > { %v1877_v22 = vpop.permute.xlu1 %1876  ;;  %v1872_v23 = vpop.permute.xlu0 %1871 }
 0x161   : > { %v1874_v24 = vunpack.i.h.bf16 %v1872_v23  ;;  %v1873_v25 = vunpack.i.l.bf16 %v1872_v23  ;;  %v1879_v32 = vunpack.i.h.bf16 %v1877_v22  ;;  %v1878_v33 = vunpack.i.l.bf16 %v1877_v22 }
 0x163   : > { %v1811_v27 = vpack.c.bf16 %v1874_v24, %v1873_v25  ;;  %v1818_v36 = vpack.c.bf16 %v1879_v32, %v1878_v33 }
 0x164   : > { %v611_v28 = vpop.permute.xlu1 %610  ;;  %v367_v29 = vpop.permute.xlu0 %366 }
 0x165   : > { %1813 = vmatpush3.bf16.xpose.msk.msra.mxu1 %vm2087_vm3, %v1811_v27 }
 0x166   : > { %1671 = vmatprep.subr.mxu1 %v1968_v6 }
 0x168   : > { %v601_v30 = vpop.permute.xlu1 %600  ;;  %v1882_v31 = vpop.permute.xlu0 %1881 }
 0x169   : > { %v1884_v40 = vunpack.i.h.bf16 %v1882_v31  ;;  %v1883_v41 = vunpack.i.l.bf16 %v1882_v31 }
 0x16b   : > { %v1825_v44 = vpack.c.bf16 %v1884_v40, %v1883_v41 }
 0x16c   : > { %v603_v34 = vpop.permute.xlu0 %602  ;;  %v605_v35 = vpop.permute.xlu1 %604 }
 0x16d   : > { %1672 = vmatpush3.xpose.msk.msra.mxu1 %vm368_vm2, %v367_v29 }
 0x16e   : > { %1817 = vmatprep.subr.bf16.mxu1 %v1966_v3 }
 0x170   : > { %1674 = vmatmul.mubr.msk.f32.vlgmr.msra.gmra.mrb[0].mxu1 %vm368_vm2, %v343_v15  ;;  %v851_v37 = vpop.permute.xlu0 %850  ;;  %v1887_v38 = vpop.permute.xlu1 %1886 }
 0x171   : > { %1820 = vmatpush3.bf16.xpose.msk.msra.mxu1 %vm2087_vm3, %v1818_v36  ;;  %1676 = vmatprep.mubr.msk.f32.mxu1 %vm1967_vm0, %v1968_v6  ;;  %v1889_v48 = vunpack.i.h.bf16 %v1887_v38  ;;  %v1888_v49 = vunpack.i.l.bf16 %v1887_v38  ;;  %v1569_v38 = vld [vmem:[%s2377_s3 + $0x48] sm:$0xff] }
 0x172   : > { %1701 = vmatprep.subr.mxu1 %v1968_v6 }
 0x173   : > { %v1832_v54 = vpack.c.bf16 %v1889_v48, %v1888_v49 }
 0x174   : > { %1677 = vmatmul.mubr.msk.f32.gmra.mrb[2].mxu1 %vm368_vm2, %v348_v16  ;;  %v841_v39 = vpop.permute.xlu0 %840  ;;  %v843_v43 = vpop.permute.xlu1 %842 }
 0x175   : > { %1679 = vmatprep.mubr.msk.f32.mxu1 %vm1967_vm0, %v1968_v6 }
 0x178   : > { %1680 = vmatmul.mubr.msk.f32.gmra.mrb[4].mxu1 %vm368_vm2, %v2070_v20  ;;  %v845_v42 = vpop.permute.xlu0 %844  ;;  %v1091_v46 = vpop.permute.xlu1 %1090 }
 0x179   : > { %1702 = vmatpush3.xpose.msk.msra.mxu1 %vm368_vm2, %v611_v28  ;;  %1703 = vmatprep.mubr.msk.f32.mxu1 %vm1967_vm0, %v1968_v6 }
 0x17a   : > { %1824 = vmatprep.subr.bf16.mxu1 %v1966_v3 }
 0x17c   : > { %1704 = vmatmul.mubr.msk.f32.vlgmr.msra.gmra.mrb[6].mxu1 %vm368_vm2, %v601_v30  ;;  %v1081_v45 = vpop.permute.xlu0 %1080  ;;  %v1083_v53 = vpop.permute.xlu1 %1082 }
 0x17d   : > { %1827 = vmatpush3.bf16.xpose.msk.msra.mxu1 %vm2087_vm3, %v1825_v44  ;;  %1706 = vmatprep.mubr.msk.f32.mxu1 %vm1967_vm0, %v1968_v6 }
 0x17e   : > { %1731 = vmatprep.subr.mxu1 %v1968_v6 }
 0x180   : > { %1707 = vmatmul.mubr.msk.f32.gmra.mrb[8].mxu1 %vm368_vm2, %v603_v34  ;;  %v1085_v47 = vpop.permute.xlu0 %1084  ;;  %v495_v56 = vpop.permute.xlu1 %494  ;;  %v1558_v34 = vld [vmem:[%s2377_s3 + $0x40] sm:$0x1] }
 0x181   : > { %1709 = vmatprep.mubr.msk.f32.mxu1 %vm1967_vm0, %v1968_v6 }
 0x184   : > { %1710 = vmatmul.mubr.msk.f32.gmra.mrb[10].mxu1 %vm368_vm2, %v605_v35  ;;  %v1892_v50 = vpop.permute.xlu0 %1891 }
 0x185   : > { %v1894_v51 = vunpack.i.h.bf16 %v1892_v50  ;;  %v1893_v52 = vunpack.i.l.bf16 %v1892_v50  ;;  %1732 = vmatpush3.xpose.msk.msra.mxu1 %vm368_vm2, %v851_v37  ;;  %1733 = vmatprep.mubr.msk.f32.mxu1 %vm1967_vm0, %v1968_v6 }
 0x186   : > { %1831 = vmatprep.subr.bf16.mxu1 %v1966_v3 }
 0x187   : > { %v1815_v55 = vpack.c.bf16 %v1894_v51, %v1893_v52  ;;  %v1557_v51 = vld [vmem:[%s2377_s3 + $0x38] sm:$0xff] }
 0x188   : > { %1734 = vmatmul.mubr.msk.f32.vlgmr.msra.gmra.mrb[12].mxu1 %vm368_vm2, %v841_v39 }
 0x189   : > { %1816 = vmatpush3.bf16.msra.mxu0 %v1815_v55  ;;  %1834 = vmatpush3.bf16.xpose.msk.msra.mxu1 %vm2087_vm3, %v1832_v54 }
 0x18a   : > { %1736 = vmatprep.mubr.msk.f32.mxu1 %vm1967_vm0, %v1968_v6  ;;  %1686 = vmatprep.subr.mxu0 %v1968_v6 }
 0x18b   : > { %1761 = vmatprep.subr.mxu1 %v1968_v6 }
 0x18c   : > { %1737 = vmatmul.mubr.msk.f32.gmra.mrb[14].mxu1 %vm368_vm2, %v843_v43 }
 0x18d   : > { %1687 = vmatpush3.msk.msra.mxu0 %vm507_vm4, %v495_v56  ;;  %1739 = vmatprep.mubr.msk.f32.mxu1 %vm1967_vm0, %v1968_v6 }
 0x18e   : > { %1821 = vmatprep.subr.bf16.mxu0 %v1966_v3 }
 0x190   : > { %1740 = vmatmul.mubr.msk.f32.gmra.mrb[16].mxu1 %vm368_vm2, %v845_v42 }
 0x191   : > { %1762 = vmatpush3.xpose.msk.msra.mxu1 %vm368_vm2, %v1091_v46  ;;  %1763 = vmatprep.mubr.msk.f32.mxu1 %vm1967_vm0, %v1968_v6  ;;  %v1571_v46 = vld [vmem:[%s2377_s3 + $0x58] sm:$0x1] }
 0x192   : > { %1838 = vmatprep.subr.bf16.mxu1 %v1966_v3 }
 0x194   : > { %1764 = vmatmul.mubr.msk.f32.vlgmr.msra.gmra.mrb[18].mxu1 %vm368_vm2, %v1081_v45 }
 0x195   : > { %1766 = vmatprep.mubr.msk.f32.mxu1 %vm1967_vm0, %v1968_v6 }
 0x198   : > { %1767 = vmatmul.mubr.msk.f32.gmra.mrb[20].mxu1 %vm368_vm2, %v1083_v53  ;;  %v1570_v53 = vld [vmem:[%s2377_s3 + $0x50] sm:$0xff] }
 0x199   : > { %1769 = vmatprep.mubr.msk.f32.mxu1 %vm1967_vm0, %v1968_v6 }
 0x19c   : > { %1770 = vmatmul.mubr.msk.f32.gmra.mrb[22].mxu1 %vm368_vm2, %v1085_v47 }
 0x19d   : > { %1795 = vmatprep.mubr.msk.f32.mxu1 %vm1967_vm0, %v1968_v6 }
 0x243   : > { %v447_v58 = vpop.f32.mrb[0].mxu1 }
 0x244   : > { %v2154_v59 = vadd.f32 %v447_v58, %v356_v57  ;;  %v1675_v60 = vpop.f32.mrb[1].mxu1  ;;  %v736_v57 = vpop.permute.xlu1 %735 }
 0x245   : > { %v1897_v58 = vpop.permute.xlu0 %1896 }
 0x246   : > { %v462_v62 = vsel %vm461_vm5, %v2154_v59, -inf }
 0x247   : > { %463 = vmax.xlane.f32.xlu1 %v462_v62  ;;  %v452_v63 = vpop.f32.mrb[2].mxu1 }
 0x248   : > { %v2161_v0 = vadd.f32 %v452_v63, %v357_v61  ;;  %v1678_v1 = vpop.f32.mrb[3].mxu1 }
 0x24a   : > { %v465_v4 = vsel %vm461_vm5, %v2161_v0, -inf }
 0x24b   : > { %466 = vmax.xlane.f32.xlu0 %v465_v4  ;;  %v457_v5 = vpop.f32.mrb[4].mxu1 }
 0x24c   : > { %v2168_v7 = vadd.f32 %v457_v5, %v358_v2  ;;  %v1681_v8 = vpop.f32.mrb[5].mxu1 }
 0x24d   : > { %v1899_v8 = vunpack.i.h.bf16 %v1897_v58 }
 0x24e   : > { %v469_v10 = vsel %vm468_vm6, %v2168_v7, -inf }
 0x24f   : > { %470 = vmax.xlane.f32.xlu0 %v469_v10  ;;  %v690_v11 = vpop.f32.mrb[6].mxu1 }
 0x250   : > { %v2175_v12 = vadd.f32 %v1543_v9, %v690_v11  ;;  %v1705_v13 = vpop.f32.mrb[7].mxu1  ;;  %v1898_v9 = vunpack.i.l.bf16 %v1897_v58 }
 0x252   : > { %v704_v15 = vsel %vm461_vm5, %v2175_v12, -inf }
 0x253   : > { %705 = vmax.xlane.f32.xlu1 %v704_v15  ;;  %v695_v16 = vpop.f32.mrb[8].mxu1 }
 0x254   : > { %v2182_v17 = vadd.f32 %v1544_v14, %v695_v16  ;;  %v1708_v19 = vpop.f32.mrb[9].mxu1 }
 0x256   : > { %v707_v22 = vsel %vm461_vm5, %v2182_v17, -inf }
 0x257   : > { %708 = vmax.xlane.f32.xlu0 %v707_v22  ;;  %v700_v23 = vpop.f32.mrb[10].mxu1 }
 0x258   : > { %v2189_v24 = vadd.f32 %v1545_v21, %v700_v23  ;;  %v1711_v25 = vpop.f32.mrb[11].mxu1 }
 0x25a   : > { %v710_v27 = vsel %vm468_vm6, %v2189_v24, -inf }
 0x25b   : > { %711 = vmax.xlane.f32.xlu1 %v710_v27  ;;  %v930_v28 = vpop.f32.mrb[12].mxu1 }
 0x25c   : > { %v2196_v29 = vadd.f32 %v1556_v26, %v930_v28  ;;  %v1735_v30 = vpop.f32.mrb[13].mxu1 }
 0x25e   : > { %v944_v31 = vsel %vm461_vm5, %v2196_v29, -inf }
 0x25f   : > { %945 = vmax.xlane.f32.xlu1 %v944_v31  ;;  %v935_v32 = vpop.f32.mrb[14].mxu1 }
 0x260   : > { %v1738_v33 = vpop.f32.mrb[15].mxu1  ;;  %v2226_v52 = vadd.f32 %v1557_v51, %v935_v32 }
 0x262   : > { %v947_v55 = vsel %vm461_vm5, %v2226_v52, -inf }
 0x263   : > { %v940_v35 = vpop.f32.mrb[16].mxu1 }
 0x264   : > { %v2203_v36 = vadd.f32 %v1558_v34, %v940_v35  ;;  %v1741_v37 = vpop.f32.mrb[17].mxu1 }
 0x266   : > { %v950_v39 = vsel %vm468_vm6, %v2203_v36, -inf }
 0x267   : > { %951 = vmax.xlane.f32.xlu1 %v950_v39  ;;  %v1170_v40 = vpop.f32.mrb[18].mxu1 }
 0x268   : > { %v2210_v41 = vadd.f32 %v1569_v38, %v1170_v40  ;;  %v1765_v42 = vpop.f32.mrb[19].mxu1 }
 0x26a   : > { %v1184_v43 = vsel %vm461_vm5, %v2210_v41, -inf }
 0x26b   : > { %1185 = vmax.xlane.f32.xlu1 %v1184_v43  ;;  %v1175_v44 = vpop.f32.mrb[20].mxu1 }
 0x26c   : > { %v1768_v45 = vpop.f32.mrb[21].mxu1  ;;  %v2231_v54 = vadd.f32 %v1570_v53, %v1175_v44 }
 0x26d   : > { %1901 = vrot.lane.b32.xlu0 %v2066_v18, %s1978_s19 }
 0x26e   : > { %v1187_v56 = vsel %vm461_vm5, %v2231_v54, -inf }
 0x26f   : > { %v1180_v47 = vpop.f32.mrb[22].mxu1 }
 0x270   : > { %v2218_v48 = vadd.f32 %v1571_v46, %v1180_v47  ;;  %v1771_v49 = vpop.f32.mrb[23].mxu1 }
 0x272   : > { %v1190_v50 = vsel %vm468_vm6, %v2218_v48, -inf }
 0x273   : > { %1191 = vmax.xlane.f32.xlu1 %v1190_v50 }
 0x284   : > { %975 = vrot.lane.b32.xlu1 %v2070_v20, %s1978_s19 }
 0x28c   : > { %948 = vmax.xlane.f32.xlu0 %v947_v55 }
 0x290   : > { %1188 = vmax.xlane.f32.xlu0 %v1187_v56 }
 0x2a6   : > { %1906 = vrot.lane.b32.xlu0 %v2066_v18, %s1979_s28 }
 0x2aa   : > { %1215 = vrot.lane.b32.xlu0 %v2070_v20, %s1979_s28 }
 0x2d4   : > { %v464_v60 = vpop.xlane.xlu1 %463 }
 0x2d5   : > { %v472_v61 = vsub.f32 %v2154_v59, %v464_v60  ;;  %v1822_v59 = vpack.c.bf16 %v1899_v8, %v1898_v9 }
 0x2d7   : > { %v475_v62 = vmul.f32 1.442695, %v472_v61 }
 0x2d8   : > { %v467_v63 = vpop.xlane.xlu0 %466 }
 0x2d9   : > { %1910 = vpow2.f32 %v475_v62  ;;  %v473_v1 = vsub.f32 %v2161_v0, %v467_v63 }
 0x2db   : > { %v477_v2 = vmul.f32 1.442695, %v473_v1 }
 0x2dc   : > { %v471_v4 = vpop.xlane.xlu0 %470 }
 0x2dd   : > { %1912 = vpow2.f32 %v477_v2  ;;  %v474_v5 = vsub.f32 %v2168_v7, %v471_v4 }
 0x2df   : > { %v479_v18 = vmul.f32 1.442695, %v474_v5 }
 0x2e0   : > { %v706_v10 = vpop.xlane.xlu1 %705 }
 0x2e1   : > { %1914 = vpow2.f32 %v479_v18  ;;  %v713_v20 = vsub.f32 %v2175_v12, %v706_v10 }
 0x2e3   : > { %v2243_v11 = vpop.eup %1910  ;;  %v716_v13 = vmul.f32 1.442695, %v713_v20 }
 0x2e4   : > { %v709_v14 = vpop.xlane.xlu0 %708  ;;  %1689 = vmatmul.mubr.msk.f32.vlgmr.msra.gmra.mrb[6].mxu0 %vm461_vm5, %v2243_v11  ;;  %v481_v5 = vsel %vm461_vm5, %v2243_v11, 0.0 }
 0x2e5   : > { %1916 = vpow2.f32 %v716_v13  ;;  %v714_v0 = vsub.f32 %v2182_v17, %v709_v14  ;;  %1823 = vmatpush3.bf16.msra.mxu0 %v1822_v59  ;;  %1691 = vmatprep.mubr.msk.f32.mxu0 %vm1967_vm0, %v1968_v6 }
 0x2e6   : > { %1716 = vmatprep.subr.mxu0 %v1968_v6 }
 0x2e7   : > { %v2251_v7 = vpop.eup %1912  ;;  %v718_v12 = vmul.f32 1.442695, %v714_v0 }
 0x2e8   : > { %v712_v15 = vpop.xlane.xlu1 %711  ;;  %v1902_v16 = vpop.permute.xlu0 %1901  ;;  %1692 = vmatmul.mubr.msk.f32.gmra.mrb[8].mxu0 %vm461_vm5, %v2251_v7  ;;  %v484_v18 = vsel %vm461_vm5, %v2251_v7, 0.0 }
 0x2e9   : > { %1918 = vpow2.f32 %v718_v12  ;;  %v715_v19 = vsub.f32 %v2189_v24, %v712_v15  ;;  %1717 = vmatpush3.msk.msra.mxu0 %vm507_vm4, %v736_v57  ;;  %1694 = vmatprep.mubr.msk.f32.mxu0 %vm1967_vm0, %v1968_v6  ;;  %v1904_v22 = vunpack.i.h.bf16 %v1902_v16  ;;  %v1903_v23 = vunpack.i.l.bf16 %v1902_v16 }
 0x2ea   : > { %1828 = vmatprep.subr.bf16.mxu0 %v1966_v3 }
 0x2eb   : > { %v2260_v17 = vpop.eup %1914  ;;  %v720_v21 = vmul.f32 1.442695, %v715_v19  ;;  %v1829_v27 = vpack.c.bf16 %v1904_v22, %v1903_v23 }
 0x2ec   : > { %1695 = vmatmul.mubr.msk.f32.gmra.mrb[10].mxu0 %vm461_vm5, %v2260_v17  ;;  %v946_v25 = vpop.xlane.xlu1 %945  ;;  %v487_v9 = vsel %vm468_vm6, %v2260_v17, 0.0 }
 0x2ed   : > { %1920 = vpow2.f32 %v720_v21  ;;  %v953_v26 = vsub.f32 %v2196_v29, %v946_v25  ;;  %1718 = vmatprep.mubr.msk.f32.mxu0 %vm1967_vm0, %v1968_v6 }
 0x2ef   : > { %v1917_v24 = vpop.eup %1916  ;;  %v956_v28 = vmul.f32 1.442695, %v953_v26 }
 0x2f0   : > { %1719 = vmatmul.mubr.msk.f32.vlgmr.msra.gmra.mrb[12].mxu0 %vm461_vm5, %v1917_v24  ;;  %v722_v30 = vsel %vm461_vm5, %v1917_v24, 0.0 }
 0x2f1   : > { %1922 = vpow2.f32 %v956_v28  ;;  %1830 = vmatpush3.bf16.msra.mxu0 %v1829_v27  ;;  %723 = vadd.xlane.f32.xlu1 %v722_v30 }
 0x2f2   : > { %1721 = vmatprep.mubr.msk.f32.mxu0 %vm1967_vm0, %v1968_v6  ;;  %1746 = vmatprep.subr.mxu0 %v1968_v6 }
 0x2f3   : > { %v1919_v31 = vpop.eup %1918 }
 0x2f4   : > { %1722 = vmatmul.mubr.msk.f32.gmra.mrb[14].mxu0 %vm461_vm5, %v1919_v31  ;;  %v725_v29 = vsel %vm461_vm5, %v1919_v31, 0.0  ;;  %v952_v32 = vpop.xlane.xlu1 %951 }
 0x2f5   : > { %726 = vadd.xlane.f32.xlu1 %v725_v29  ;;  %1724 = vmatprep.mubr.msk.f32.mxu0 %vm1967_vm0, %v1968_v6  ;;  %v955_v42 = vsub.f32 %v2203_v36, %v952_v32  ;;  %v1363_v32 = vld [vmem:[%s2378_s4] sm:$0xff] }
 0x2f7   : > { %v1921_v33 = vpop.eup %1920  ;;  %v960_v47 = vmul.f32 1.442695, %v955_v42 }
 0x2f8   : > { %1725 = vmatmul.mubr.msk.f32.gmra.mrb[16].mxu0 %vm461_vm5, %v1921_v33  ;;  %v1186_v35 = vpop.xlane.xlu1 %1185  ;;  %v728_v1 = vsel %vm468_vm6, %v1921_v33, 0.0  ;;  %v1364_v33 = vld [vmem:[%s2378_s4 + $0x8] sm:$0xff] }
 0x2f9   : > { %1748 = vmatprep.mubr.msk.f32.mxu0 %vm1967_vm0, %v1968_v6  ;;  %v1193_v40 = vsub.f32 %v2210_v41, %v1186_v35 }
 0x2fb   : > { %v1923_v34 = vpop.eup %1922  ;;  %v1196_v45 = vmul.f32 1.442695, %v1193_v40 }
 0x2fc   : > { %v962_v37 = vsel %vm461_vm5, %v1923_v34, 0.0 }
 0x2fd   : > { %963 = vadd.xlane.f32.xlu0 %v962_v37  ;;  %v1839_v37 = vpack.c.bf16 %v1364_v33, %v1363_v32 }
 0x2ff   : > { %1840 = vmatpush3.bf16.msra.mxu1 %v1839_v37 }
 0x300   : > { %v1192_v38 = vpop.xlane.xlu1 %1191  ;;  %1841 = vmatprep.subr.bf16.mxu1 %v1966_v3 }
 0x301   : > { %v1195_v51 = vsub.f32 %v2218_v48, %v1192_v38  ;;  %v1366_v38 = vld [vmem:[%s2378_s4 + $0x18] sm:$0xff] }
 0x303   : > { %v1200_v36 = vmul.f32 1.442695, %v1195_v51 }
 0x304   : > { %v976_v39 = vpop.permute.xlu1 %975 }
 0x305   : > { %1747 = vmatpush3.msk.msra.mxu0 %vm507_vm4, %v976_v39 }
 0x306   : > { %1749 = vmatmul.mubr.msk.f32.vlgmr.msra.gmra.mrb[18].mxu0 %vm461_vm5, %v1923_v34  ;;  %1835 = vmatprep.subr.bf16.mxu0 %v1966_v3  ;;  %v1365_v34 = vld [vmem:[%s2378_s4 + $0x10] sm:$0xff] }
 0x307   : > { %1751 = vmatprep.mubr.msk.f32.mxu0 %vm1967_vm0, %v1968_v6  ;;  %v1842_v39 = vpack.c.bf16 %v1366_v38, %v1365_v34 }
 0x309   : > { %1843 = vmatpush3.bf16.msra.mxu1 %v1842_v39 }
 0x319   : > { %v949_v43 = vpop.xlane.xlu0 %948 }
 0x31a   : > { %v954_v44 = vsub.f32 %v2226_v52, %v949_v43 }
 0x31c   : > { %v958_v46 = vmul.f32 1.442695, %v954_v44 }
 0x31d   : > { %v1189_v49 = vpop.xlane.xlu0 %1188 }
 0x31e   : > { %1924 = vpow2.f32 %v958_v46  ;;  %v1194_v50 = vsub.f32 %v2231_v54, %v1189_v49 }
 0x31f   : > { %1926 = vpow2.f32 %v1196_v45 }
 0x320   : > { %v1198_v53 = vmul.f32 1.442695, %v1194_v50  ;;  %1928 = vpow2.f32 %v960_v47 }
 0x321   : > { %v1907_v55 = vpop.permute.xlu0 %1906 }
 0x322   : > { %1930 = vpow2.f32 %v1198_v53  ;;  %v1909_v41 = vunpack.i.h.bf16 %v1907_v55  ;;  %v1908_v56 = vunpack.i.l.bf16 %v1907_v55 }
 0x323   : > { %1932 = vpow2.f32 %v1200_v36 }
 0x324   : > { %v1836_v57 = vpack.c.bf16 %v1909_v41, %v1908_v56 }
 0x325   : > { %v1216_v58 = vpop.permute.xlu0 %1215 }
 0x326   : > { %1837 = vmatpush3.bf16.msra.mxu0 %v1836_v57 }
 0x327   : > { %1776 = vmatprep.subr.mxu0 %v1968_v6 }
 0x328   : > { %v1925_v52 = vpop.eup %1924 }
 0x329   : > { %1752 = vmatmul.mubr.msk.f32.gmra.mrb[20].mxu0 %vm461_vm5, %v1925_v52  ;;  %v965_v54 = vsel %vm461_vm5, %v1925_v52, 0.0  ;;  %v1927_v60 = vpop.eup %1926 }
 0x32a   : > { %966 = vadd.xlane.f32.xlu0 %v965_v54  ;;  %1777 = vmatpush3.msk.msra.mxu0 %vm507_vm4, %v1216_v58  ;;  %v1929_v48 = vpop.eup %1928  ;;  %v1202_v62 = vsel %vm461_vm5, %v1927_v60, 0.0 }
 0x32b   : > { %1754 = vmatprep.mubr.msk.f32.mxu0 %vm1967_vm0, %v1968_v6  ;;  %v968_v2 = vsel %vm468_vm6, %v1929_v48, 0.0 }
 0x32c   : > { %v1931_v61 = vpop.eup %1930 }
 0x32d   : > { %1755 = vmatmul.mubr.msk.f32.gmra.mrb[22].mxu0 %vm461_vm5, %v1929_v48  ;;  %v1205_v63 = vsel %vm461_vm5, %v1931_v61, 0.0  ;;  %v1933_v4 = vpop.eup %1932 }
 0x32e   : > { %1203 = vadd.xlane.f32.xlu0 %v1202_v62  ;;  %1206 = vadd.xlane.f32.xlu1 %v1205_v63  ;;  %v1208_v8 = vsel %vm468_vm6, %v1933_v4, 0.0 }
 0x32f   : > { %1778 = vmatprep.mubr.msk.f32.mxu0 %vm1967_vm0, %v1968_v6 }
 0x331   : > { %1779 = vmatmul.mubr.msk.f32.vlgmr.msra.gmra.mrb[24].mxu0 %vm461_vm5, %v1927_v60 }
 0x332   : > { %729 = vadd.xlane.f32.xlu0 %v728_v1  ;;  %969 = vadd.xlane.f32.xlu1 %v968_v2 }
 0x333   : > { %1781 = vmatprep.mubr.msk.f32.mxu0 %vm1967_vm0, %v1968_v6 }
 0x335   : > { %1782 = vmatmul.mubr.msk.f32.gmra.mrb[26].mxu0 %vm461_vm5, %v1931_v61 }
 0x336   : > { %482 = vadd.xlane.f32.xlu1 %v481_v5  ;;  %1209 = vadd.xlane.f32.xlu0 %v1208_v8 }
 0x337   : > { %1784 = vmatprep.mubr.msk.f32.mxu0 %vm1967_vm0, %v1968_v6 }
 0x339   : > { %1785 = vmatmul.mubr.msk.f32.gmra.mrb[28].mxu0 %vm461_vm5, %v1933_v4 }
 0x33a   : > { %488 = vadd.xlane.f32.xlu1 %v487_v9  ;;  %485 = vadd.xlane.f32.xlu0 %v484_v18 }
 0x37e   : > { %v724_v10 = vpop.xlane.xlu1 %723 }
 0x37f   : > { %1934 = vrcp.f32 %v724_v10 }
 0x382   : > { %v727_v59 = vpop.xlane.xlu1 %726 }
 0x383   : > { %1936 = vrcp.f32 %v727_v59 }
 0x389   : > { %v1935_v15 = vpop.eup %1934 }
 0x38a   : > { %v964_v26 = vpop.xlane.xlu0 %963 }
 0x38b   : > { %1938 = vrcp.f32 %v964_v26 }
 0x38d   : > { %v1937_v7 = vpop.eup %1936 }
 0x395   : > { %v1939_v27 = vpop.eup %1938 }
 0x3b7   : > { %v2317_v20 = vpop.f32.mrb[6].mxu0  ;;  %v967_v29 = vpop.xlane.xlu0 %966 }
 0x3b8   : > { %v1690_v11 = vpop.f32.mrb[7].mxu0  ;;  %1940 = vrcp.f32 %v967_v29 }
 0x3bb   : > { %v2319_v13 = vpop.f32.mrb[8].mxu0  ;;  %v1204_v35 = vpop.xlane.xlu0 %1203 }
 0x3bc   : > { %v1693_v14 = vpop.f32.mrb[9].mxu0  ;;  %v1207_v40 = vpop.xlane.xlu1 %1206  ;;  %1942 = vrcp.f32 %v1204_v35 }
 0x3bf   : > { %v2321_v0 = vpop.f32.mrb[10].mxu0  ;;  %v730_v42 = vpop.xlane.xlu0 %729 }
 0x3c0   : > { %v1696_v12 = vpop.f32.mrb[11].mxu0  ;;  %1944 = vrcp.f32 %v730_v42  ;;  %v970_v47 = vpop.xlane.xlu1 %969 }
 0x3c1   : > { %1946 = vrcp.f32 %v1207_v40 }
 0x3c2   : > { %v1941_v43 = vpop.eup %1940  ;;  %1948 = vrcp.f32 %v970_v47 }
 0x3c3   : > { %v816_v16 = vpop.f32.mrb[12].mxu0  ;;  %v1210_v49 = vpop.xlane.xlu0 %1209 }
 0x3c4   : > { %v833_v19 = vmul.f32 %v1935_v15, %v816_v16  ;;  %v1720_v17 = vpop.f32.mrb[13].mxu0  ;;  %1950 = vrcp.f32 %v1210_v49  ;;  %v483_v2 = vpop.xlane.xlu1 %482 }
 0x3c5   : > { %1952 = vrcp.f32 %v483_v2 }
 0x3c6   : > { %1319 = vrot.lane.b32.xlu0 %v833_v19, %s1980_s29  ;;  %v1943_v53 = vpop.eup %1942 }
 0x3c7   : > { %v821_v21 = vpop.f32.mrb[14].mxu0  ;;  %v486_v4 = vpop.xlane.xlu0 %485 }
 0x3c8   : > { %v834_v22 = vmul.f32 %v1937_v7, %v821_v21  ;;  %v1723_v23 = vpop.f32.mrb[15].mxu0  ;;  %1954 = vrcp.f32 %v486_v4  ;;  %v489_v5 = vpop.xlane.xlu1 %488 }
 0x3c9   : > { %1956 = vrcp.f32 %v489_v5 }
 0x3ca   : > { %1321 = vrot.lane.b32.xlu0 %v834_v22, %s1980_s29  ;;  %v1945_v56 = vpop.eup %1944 }
 0x3cb   : > { %v826_v25 = vpop.f32.mrb[16].mxu0  ;;  %v1947_v36 = vpop.eup %1946 }
 0x3cc   : > { %v1726_v24 = vpop.f32.mrb[17].mxu0  ;;  %v835_v52 = vmul.f32 %v1945_v56, %v826_v25  ;;  %v1949_v60 = vpop.eup %1948 }
 0x3ce   : > { %v1951_v48 = vpop.eup %1950 }
 0x3cf   : > { %v1953_v9 = vpop.eup %1952 }
 0x3d0   : > { %v593_v11 = vmul.f32 %v1953_v9, %v2317_v20 }
 0x3d2   : > { %v1955_v59 = vpop.eup %1954 }
 0x3d3   : > { %v594_v19 = vmul.f32 %v1955_v59, %v2319_v13  ;;  %v1957_v7 = vpop.eup %1956 }
 0x3d4   : > { %v595_v26 = vmul.f32 %v1957_v7, %v2321_v0 }
 0x3d9   : > { %v1056_v28 = vpop.f32.mrb[18].mxu0 }
 0x3da   : > { %v1073_v30 = vmul.f32 %v1939_v27, %v1056_v28  ;;  %v1750_v31 = vpop.f32.mrb[19].mxu0 }
 0x3db   : > { %v1582_v31 = vld [vmem:[%s2379_s5] ss:$0 sm:$0xff] }
 0x3dc   : > { %1331 = vrot.lane.b32.xlu1 %v1073_v30, %s1981_s30 }
 0x3fc   : > { %v1061_v44 = vpop.f32.mrb[20].mxu0 }
 0x3fd   : > { %v1074_v45 = vmul.f32 %v1941_v43, %v1061_v44  ;;  %v1753_v46 = vpop.f32.mrb[21].mxu0 }
 0x3ff   : > { %1333 = vrot.lane.b32.xlu1 %v1074_v45, %s1981_s30 }
 0x400   : > { %v1066_v50 = vpop.f32.mrb[22].mxu0 }
 0x401   : > { %v1756_v51 = vpop.f32.mrb[23].mxu0  ;;  %v1075_v62 = vmul.f32 %v1949_v60, %v1066_v50 }
 0x404   : > { %v1296_v3 = vpop.f32.mrb[24].mxu0 }
 0x405   : > { %v1313_v55 = vmul.f32 %v1943_v53, %v1296_v3  ;;  %v1780_v41 = vpop.f32.mrb[25].mxu0 }
 0x407   : > { %1343 = vrot.lane.b32.xlu1 %v1313_v55, %s1982_s16 }
 0x408   : > { %v1301_v57 = vpop.f32.mrb[26].mxu0 }
 0x409   : > { %v1314_v58 = vmul.f32 %v1947_v36, %v1301_v57  ;;  %v1783_v54 = vpop.f32.mrb[27].mxu0 }
 0x40b   : > { %1323 = vrot.lane.b32.xlu1 %v835_v52, %s1980_s29  ;;  %1345 = vrot.lane.b32.xlu0 %v1314_v58, %s1982_s16 }
 0x40c   : > { %v1306_v61 = vpop.f32.mrb[28].mxu0 }
 0x40d   : > { %v1315_v63 = vmul.f32 %v1951_v48, %v1306_v61  ;;  %v1786_v1 = vpop.f32.mrb[29].mxu0 }
 0x40f   : > { %1335 = vrot.lane.b32.xlu0 %v1075_v62, %s1981_s30  ;;  %1347 = vrot.lane.b32.xlu1 %v1315_v63, %s1982_s16 }
 0x438   : > { %v1320_v18 = vpop.permute.xlu0 %1319 }
 0x439   : > { %v1352_v14 = vsel %vm368_vm2, %v593_v11, %v1320_v18 }
 0x43c   : > { %v1322_v12 = vpop.permute.xlu0 %1321 }
 0x43d   : > { %v1353_v21 = vsel %vm368_vm2, %v594_v19, %v1322_v12 }
 0x44e   : > { %v1332_v8 = vpop.permute.xlu1 %1331 }
 0x44f   : > { %v1356_v15 = vsel %vm1355_vm7, %v1352_v14, %v1332_v8 }
 0x471   : > { %v1334_v10 = vpop.permute.xlu1 %1333 }
 0x472   : > { %v1357_v20 = vsel %vm1355_vm7, %v1353_v21, %v1334_v10 }
 0x479   : > { %v1344_v16 = vpop.permute.xlu1 %1343 }
 0x47a   : > { %v1360_v17 = vsel %vm1359_vm8, %v1356_v15, %v1344_v16 }
 0x47b   : > { %1796 = vmatmul.mubr.msk.f32.vlgmr.msra.gmra.mrb[24].mxu1 %vm266_vm1, %v1360_v17 }
 0x47c   : > { %1798 = vmatprep.mubr.msk.f32.mxu1 %vm1967_vm0, %v1968_v6 }
 0x47d   : > { %v1324_v22 = vpop.permute.xlu1 %1323  ;;  %v1346_v23 = vpop.permute.xlu0 %1345 }
 0x47e   : > { %v1361_v25 = vsel %vm1359_vm8, %v1357_v20, %v1346_v23  ;;  %v1354_v13 = vsel %vm368_vm2, %v595_v26, %v1324_v22 }
 0x47f   : > { %1799 = vmatmul.mubr.msk.f32.gmra.mrb[26].mxu1 %vm266_vm1, %v1361_v25 }
 0x480   : > { %1801 = vmatprep.mubr.msk.f32.mxu1 %vm1967_vm0, %v1968_v6 }
 0x481   : > { %v1336_v24 = vpop.permute.xlu0 %1335  ;;  %v1348_v27 = vpop.permute.xlu1 %1347 }
 0x482   : > { %v1358_v28 = vsel %vm1355_vm7, %v1354_v13, %v1336_v24 }
 0x483   : > { %v1362_v30 = vsel %vm1359_vm8, %v1358_v28, %v1348_v27 }
 0x484   : > { %1802 = vmatmul.mubr.msk.f32.gmra.mrb[28].mxu1 %vm266_vm1, %v1362_v30 }
 0x54e   : > { %v1449_v6 = vpop.f32.mrb[24].mxu1 }
 0x54f   : > { %v1450_v0 = vadd.f32 %v1582_v31, %v1449_v6  ;;  %v1797_v29 = vpop.f32.mrb[25].mxu1 }
 0x551   : > { %1463 = vst.msk [vmem:[%s251_s23] sm:$0xff] %vm266_vm1, %v1450_v0 }
 0x552   : > { %v1454_v32 = vpop.f32.mrb[26].mxu1 }
 0x553   : > { %v1455_v33 = vadd.f32 %v1582_v31, %v1454_v32  ;;  %v1800_v34 = vpop.f32.mrb[27].mxu1 }
 0x555   : > { %1464 = vst.msk [vmem:[%s251_s23 + $0x8] sm:$0xff] %vm266_vm1, %v1455_v33 }
 0x557   : > { %v1459_v35 = vpop.f32.mrb[28].mxu1 }
 0x558   : > { %v1460_v37 = vadd.f32 %v1582_v31, %v1459_v35  ;;  %v1803_v38 = vpop.f32.mrb[29].mxu1 }
 0x55a   : > { %1466 = vst.msk [vmem:[%s251_s23 + $0x10] sm:$0x1] %vm1465_vm9, %v1460_v37 }
 0x55b PF: > { %s16_s21 = sadd.s32 1, %s1964_s21  }
 0x55c   : > { %p13_p4 = scmp.ge.s32.totalorder %s16_s21, 4  }
 0x55e   :  { %15 = sbr.rel (!%p13_p4) target bundleno = 1 (0x1), region = 77 }

</bundles_post_ra>
